<compile_context>
chip_gen: v6e
topology: v6e:2x2x1
jax: 0.10.0
libtpu: 0.0.40
codegen_flags: <defaults>
</compile_context>

<pallas_src>
import functools

import jax
import jax.numpy as jnp
import numpy as np
from jax import lax
from jax.experimental import pallas as pl
from jax.experimental.pallas import tpu as pltpu


def _conv_taps_flat(x, w, masks, *, k, W, HW):
    """Depthwise conv on flattened spatial rows.

    x:     (BC, HW) f32  -- BC images, each a flattened (H, W) plane
    w:     (BC, k*k) f32 -- per-image (i.e. per-channel) conv taps
    masks: (k*k, HW) f32 -- 0/1 border-validity mask per tap (zero padding)
    returns (BC, HW) f32 conv output (no bias).
    """
    p = k // 2
    acc = jnp.zeros(x.shape, jnp.float32)
    t = 0
    for a in range(-p, p + 1):          # vertical tap offset
        for b in range(-p, p + 1):      # horizontal tap offset
            s = a * W + b               # flat source offset: x[i+a, j+b]
            if s == 0:
                shifted = x
            else:
                # rolled[q] = x[(q + s) % HW]; wrap positions are masked out.
                shifted = pltpu.roll(x, shift=(-s) % HW, axis=1)
            acc = acc + shifted * masks[t:t + 1, :] * w[:, t:t + 1]
            t += 1
    return acc


def _dwconv_stats_kernel(x_ref, w_ref, m_ref, sum_ref, ssq_ref, *, k, W, HW):
    """Pass 1: per-image sum and sum-of-squares of the depthwise conv output."""
    conv = _conv_taps_flat(x_ref[...], w_ref[...], m_ref[...], k=k, W=W, HW=HW)
    sum_ref[...] = jnp.sum(conv, axis=1, keepdims=True)
    ssq_ref[...] = jnp.sum(conv * conv, axis=1, keepdims=True)


def _dwconv_bn_relu_kernel(x_ref, w_ref, m_ref, scale_ref, shift_ref, o_ref,
                           *, k, W, HW):
    """Pass 2: recompute conv, apply fused BN affine (scale, shift) + ReLU."""
    conv = _conv_taps_flat(x_ref[...], w_ref[...], m_ref[...], k=k, W=W, HW=HW)
    y = conv * scale_ref[...] + shift_ref[...]
    o_ref[...] = jnp.maximum(y, 0.0)


def _pick_block_images(nc, hw, bytes_per_elem=4, budget=2 * 1024 * 1024):
    """Largest multiple-of-8 divisor of nc whose (bc, hw) block fits the budget."""
    cands = [bc for bc in range(8, nc + 1, 8) if nc % bc == 0]
    if not cands:
        return nc                       # tiny / odd nc: single full-dim block
    fitting = [bc for bc in cands if bc * hw * bytes_per_elem <= budget]
    return max(fitting) if fitting else min(cands)


def depthwise_conv_bn_relu(x_nchw, weight, bias, gamma, beta, *, eps=1e-5):
    """x_nchw: (N, C, H, W); weight: (C, 1, k, k) (PyTorch depthwise layout)."""
    N, C, H, W = x_nchw.shape
    k = weight.shape[-1]
    assert k % 2 == 1, "odd kernel_size assumed (padding = k // 2 keeps H, W)"
    p = k // 2
    KK = k * k
    NC, HW = N * C, H * W

    # Free metadata reshape (NCHW is contiguous): no transpose, no HBM pass.
    x_flat = x_nchw.reshape(NC, HW).astype(jnp.float32)

    # Per-image tap weights: row n*C + c holds weight[c, 0] flattened.
    w_ck = weight.reshape(C, KK).astype(jnp.float32)
    w_nc = jnp.tile(w_ck, (N, 1))                                   # (NC, KK)

    # Static 0/1 border masks per tap (implements the conv's zero padding).
    q = np.arange(HW)
    ii, jj = q // W, q % W
    m_np = np.zeros((KK, HW), np.float32)
    t = 0
    for a in range(-p, p + 1):
        for b in range(-p, p + 1):
            ok = (ii + a >= 0) & (ii + a < H) & (jj + b >= 0) & (jj + b < W)
            m_np[t] = ok.astype(np.float32)
            t += 1
    masks = jnp.asarray(m_np)                                       # (KK, HW)

    BC = _pick_block_images(NC, HW)
    grid = (NC // BC,)
    cparams = pltpu.CompilerParams(
        dimension_semantics=("parallel",),       # megacore sharding on v7x
        vmem_limit_bytes=32 * 1024 * 1024)

    x_spec = pl.BlockSpec((BC, HW), lambda i: (i, 0))
    w_spec = pl.BlockSpec((BC, KK), lambda i: (i, 0))
    m_spec = pl.BlockSpec((KK, HW), lambda i: (0, 0))
    col_spec = pl.BlockSpec((BC, 1), lambda i: (i, 0))

    conv_flops = 3 * NC * HW * KK
    param_bytes = 4 * NC * (KK + 2) + 4 * KK * HW

    # ---- Pass 1: per-image conv statistics ---------------------------------
    s_img, q_img = pl.pallas_call(
        functools.partial(_dwconv_stats_kernel, k=k, W=W, HW=HW),
        grid=grid,
        in_specs=[x_spec, w_spec, m_spec],
        out_specs=(col_spec, col_spec),
        out_shape=(jax.ShapeDtypeStruct((NC, 1), jnp.float32),
                   jax.ShapeDtypeStruct((NC, 1), jnp.float32)),
        compiler_params=cparams,
        cost_estimate=pl.CostEstimate(
            flops=conv_flops + 4 * NC * HW, transcendentals=0,
            bytes_accessed=4 * NC * HW + param_bytes),
    )(x_flat, w_nc, masks)

    # ---- Tiny per-channel epilogue in plain JAX (C scalars) ----------------
    M = N * H * W
    sum_c = s_img.reshape(N, C).sum(axis=0)
    ssq_c = q_img.reshape(N, C).sum(axis=0)
    mean_conv = sum_c / M
    var = jnp.maximum(ssq_c / M - mean_conv * mean_conv, 0.0)   # biased var
    bias_f = bias.astype(jnp.float32)
    mu = mean_conv + bias_f                       # batch mean of (conv + bias)
    scale = gamma.astype(jnp.float32) * lax.rsqrt(var + eps)
    shift = beta.astype(jnp.float32) + (bias_f - mu) * scale
    scale_nc = jnp.tile(scale, N).reshape(NC, 1)
    shift_nc = jnp.tile(shift, N).reshape(NC, 1)

    # ---- Pass 2: conv + fused BN affine + ReLU -----------------------------
    out_flat = pl.pallas_call(
        functools.partial(_dwconv_bn_relu_kernel, k=k, W=W, HW=HW),
        grid=grid,
        in_specs=[x_spec, w_spec, m_spec, col_spec, col_spec],
        out_specs=x_spec,
        out_shape=jax.ShapeDtypeStruct((NC, HW), jnp.float32),
        compiler_params=cparams,
        cost_estimate=pl.CostEstimate(
            flops=conv_flops + 3 * NC * HW, transcendentals=0,
            bytes_accessed=8 * NC * HW + param_bytes),
    )(x_flat, w_nc, masks, scale_nc, shift_nc)

    # TODO(synk): BatchNorm running_mean / running_var momentum update (a
    # training-state side effect) is not materialized; forward output is exact.
    return out_flat.reshape(N, C, H, W)


def _reference_forward(x, weight, bias, gamma, beta, eps=1e-5):
    """Plain-JAX reference mirroring the PyTorch module (train-mode BN)."""
    C = x.shape[1]
    k = weight.shape[-1]
    p = k // 2
    out = lax.conv_general_dilated(
        x.astype(jnp.float32), weight.astype(jnp.float32),
        window_strides=(1, 1), padding=[(p, p), (p, p)],
        dimension_numbers=("NCHW", "OIHW", "NCHW"),
        feature_group_count=C,
    )
    out = out + bias[None, :, None, None]
    mu = jnp.mean(out, axis=(0, 2, 3), keepdims=True)
    var = jnp.mean((out - mu) ** 2, axis=(0, 2, 3), keepdims=True)
    out = (out - mu) * lax.rsqrt(var + eps)
    out = out * gamma[None, :, None, None] + beta[None, :, None, None]
    return jnp.maximum(out, 0.0)


if __name__ == "__main__":
    N, C, H, W, K = 2, 4, 16, 16, 3

    key = jax.random.PRNGKey(0)
    k1, k2, k3, k4, k5 = jax.random.split(key, 5)
    x = jax.random.normal(k1, (N, C, H, W), jnp.float32)
    # nn.Conv2d(in, in, K, groups=in) -> weight (C, 1, K, K), bias (C,)
    conv_w = 0.2 * jax.random.normal(k2, (C, 1, K, K), jnp.float32)
    conv_b = 0.1 * jax.random.normal(k3, (C,), jnp.float32)
    # nn.BatchNorm2d(C) affine params (perturbed from defaults)
    bn_gamma = 1.0 + 0.1 * jax.random.normal(k4, (C,), jnp.float32)
    bn_beta = 0.1 * jax.random.normal(k5, (C,), jnp.float32)

    out = depthwise_conv_bn_relu(x, conv_w, conv_b, bn_gamma, bn_beta)
    out = jax.block_until_ready(out)

    ref = _reference_forward(x, conv_w, conv_b, bn_gamma, bn_beta)
    assert out.shape == (N, C, H, W)
    assert jnp.allclose(out, ref, atol=1e-4, rtol=1e-4), float(
        jnp.max(jnp.abs(out - ref)))

    print("KERNEL_OK")
</pallas_src>

<mosaic_0001>
module attributes {stable_mosaic.version = 11 : i64} {
  func.func @_dwconv_stats_kernel(%arg0: i32, %arg1: memref<8x256xf32, #tpu.memory_space<vmem>>, %arg2: memref<8x9xf32, #tpu.memory_space<vmem>>, %arg3: memref<9x256xf32, #tpu.memory_space<vmem>>, %arg4: memref<8x1xf32, #tpu.memory_space<vmem>>, %arg5: memref<8x1xf32, #tpu.memory_space<vmem>>) attributes {dimension_semantics = [#tpu.dimension_semantics<parallel>], iteration_bounds = array<i64: 1>, scalar_prefetch = 0 : i64, scratch_operands = 0 : i64, tpu.core_type = #tpu.core_type<tc>, window_params = [{transform_indices = @transform_0, window_bounds = array<i64: 8, 256>}, {transform_indices = @transform_1, window_bounds = array<i64: 8, 9>}, {pipeline_mode = #tpu.pipeline_mode<synchronous>, transform_indices = @transform_2, window_bounds = array<i64: 9, 256>}, {transform_indices = @transform_3, window_bounds = array<i64: 8, 1>}, {transform_indices = @transform_4, window_bounds = array<i64: 8, 1>}]} {
    %c0 = arith.constant 0 : index
    %c0_0 = arith.constant 0 : index
    %0 = vector.load %arg1[%c0, %c0_0] : memref<8x256xf32, #tpu.memory_space<vmem>>, vector<8x256xf32>
    %c0_1 = arith.constant 0 : index
    %c0_2 = arith.constant 0 : index
    %1 = vector.load %arg2[%c0_1, %c0_2] : memref<8x9xf32, #tpu.memory_space<vmem>>, vector<8x9xf32>
    %c0_3 = arith.constant 0 : index
    %c0_4 = arith.constant 0 : index
    %2 = vector.load %arg3[%c0_3, %c0_4] : memref<9x256xf32, #tpu.memory_space<vmem>>, vector<9x256xf32>
    %cst = arith.constant 0.000000e+00 : f32
    %3 = vector.broadcast %cst : f32 to vector<8x256xf32>
    %c17_i32 = arith.constant 17 : i32
    %4 = tpu.dynamic_rotate %0 by %c17_i32 dim 1 : vector<8x256xf32>, i32 -> vector<8x256xf32>
    %5 = vector.extract_strided_slice %2 {offsets = [0, 0], sizes = [1, 256], strides = [1, 1]} : vector<9x256xf32> to vector<1x256xf32>
    %6 = vector.broadcast %5 : vector<1x256xf32> to vector<8x256xf32>
    %7 = arith.mulf %4, %6 : vector<8x256xf32>
    %8 = vector.extract_strided_slice %1 {offsets = [0, 0], sizes = [8, 1], strides = [1, 1]} : vector<8x9xf32> to vector<8x1xf32>
    %9 = vector.broadcast %8 : vector<8x1xf32> to vector<8x256xf32>
    %10 = arith.mulf %7, %9 : vector<8x256xf32>
    %11 = arith.addf %3, %10 : vector<8x256xf32>
    %c16_i32 = arith.constant 16 : i32
    %12 = tpu.dynamic_rotate %0 by %c16_i32 dim 1 : vector<8x256xf32>, i32 -> vector<8x256xf32>
    %13 = vector.extract_strided_slice %2 {offsets = [1, 0], sizes = [1, 256], strides = [1, 1]} : vector<9x256xf32> to vector<1x256xf32>
    %14 = vector.broadcast %13 : vector<1x256xf32> to vector<8x256xf32>
    %15 = arith.mulf %12, %14 : vector<8x256xf32>
    %16 = vector.extract_strided_slice %1 {offsets = [0, 1], sizes = [8, 1], strides = [1, 1]} : vector<8x9xf32> to vector<8x1xf32>
    %17 = vector.broadcast %16 : vector<8x1xf32> to vector<8x256xf32>
    %18 = arith.mulf %15, %17 : vector<8x256xf32>
    %19 = arith.addf %11, %18 : vector<8x256xf32>
    %c15_i32 = arith.constant 15 : i32
    %20 = tpu.dynamic_rotate %0 by %c15_i32 dim 1 : vector<8x256xf32>, i32 -> vector<8x256xf32>
    %21 = vector.extract_strided_slice %2 {offsets = [2, 0], sizes = [1, 256], strides = [1, 1]} : vector<9x256xf32> to vector<1x256xf32>
    %22 = vector.broadcast %21 : vector<1x256xf32> to vector<8x256xf32>
    %23 = arith.mulf %20, %22 : vector<8x256xf32>
    %24 = vector.extract_strided_slice %1 {offsets = [0, 2], sizes = [8, 1], strides = [1, 1]} : vector<8x9xf32> to vector<8x1xf32>
    %25 = vector.broadcast %24 : vector<8x1xf32> to vector<8x256xf32>
    %26 = arith.mulf %23, %25 : vector<8x256xf32>
    %27 = arith.addf %19, %26 : vector<8x256xf32>
    %c1_i32 = arith.constant 1 : i32
    %28 = tpu.dynamic_rotate %0 by %c1_i32 dim 1 : vector<8x256xf32>, i32 -> vector<8x256xf32>
    %29 = vector.extract_strided_slice %2 {offsets = [3, 0], sizes = [1, 256], strides = [1, 1]} : vector<9x256xf32> to vector<1x256xf32>
    %30 = vector.broadcast %29 : vector<1x256xf32> to vector<8x256xf32>
    %31 = arith.mulf %28, %30 : vector<8x256xf32>
    %32 = vector.extract_strided_slice %1 {offsets = [0, 3], sizes = [8, 1], strides = [1, 1]} : vector<8x9xf32> to vector<8x1xf32>
    %33 = vector.broadcast %32 : vector<8x1xf32> to vector<8x256xf32>
    %34 = arith.mulf %31, %33 : vector<8x256xf32>
    %35 = arith.addf %27, %34 : vector<8x256xf32>
    %36 = vector.extract_strided_slice %2 {offsets = [4, 0], sizes = [1, 256], strides = [1, 1]} : vector<9x256xf32> to vector<1x256xf32>
    %37 = vector.broadcast %36 : vector<1x256xf32> to vector<8x256xf32>
    %38 = arith.mulf %0, %37 : vector<8x256xf32>
    %39 = vector.extract_strided_slice %1 {offsets = [0, 4], sizes = [8, 1], strides = [1, 1]} : vector<8x9xf32> to vector<8x1xf32>
    %40 = vector.broadcast %39 : vector<8x1xf32> to vector<8x256xf32>
    %41 = arith.mulf %38, %40 : vector<8x256xf32>
    %42 = arith.addf %35, %41 : vector<8x256xf32>
    %c255_i32 = arith.constant 255 : i32
    %43 = tpu.dynamic_rotate %0 by %c255_i32 dim 1 : vector<8x256xf32>, i32 -> vector<8x256xf32>
    %44 = vector.extract_strided_slice %2 {offsets = [5, 0], sizes = [1, 256], strides = [1, 1]} : vector<9x256xf32> to vector<1x256xf32>
    %45 = vector.broadcast %44 : vector<1x256xf32> to vector<8x256xf32>
    %46 = arith.mulf %43, %45 : vector<8x256xf32>
    %47 = vector.extract_strided_slice %1 {offsets = [0, 5], sizes = [8, 1], strides = [1, 1]} : vector<8x9xf32> to vector<8x1xf32>
    %48 = vector.broadcast %47 : vector<8x1xf32> to vector<8x256xf32>
    %49 = arith.mulf %46, %48 : vector<8x256xf32>
    %50 = arith.addf %42, %49 : vector<8x256xf32>
    %c241_i32 = arith.constant 241 : i32
    %51 = tpu.dynamic_rotate %0 by %c241_i32 dim 1 : vector<8x256xf32>, i32 -> vector<8x256xf32>
    %52 = vector.extract_strided_slice %2 {offsets = [6, 0], sizes = [1, 256], strides = [1, 1]} : vector<9x256xf32> to vector<1x256xf32>
    %53 = vector.broadcast %52 : vector<1x256xf32> to vector<8x256xf32>
    %54 = arith.mulf %51, %53 : vector<8x256xf32>
    %55 = vector.extract_strided_slice %1 {offsets = [0, 6], sizes = [8, 1], strides = [1, 1]} : vector<8x9xf32> to vector<8x1xf32>
    %56 = vector.broadcast %55 : vector<8x1xf32> to vector<8x256xf32>
    %57 = arith.mulf %54, %56 : vector<8x256xf32>
    %58 = arith.addf %50, %57 : vector<8x256xf32>
    %c240_i32 = arith.constant 240 : i32
    %59 = tpu.dynamic_rotate %0 by %c240_i32 dim 1 : vector<8x256xf32>, i32 -> vector<8x256xf32>
    %60 = vector.extract_strided_slice %2 {offsets = [7, 0], sizes = [1, 256], strides = [1, 1]} : vector<9x256xf32> to vector<1x256xf32>
    %61 = vector.broadcast %60 : vector<1x256xf32> to vector<8x256xf32>
    %62 = arith.mulf %59, %61 : vector<8x256xf32>
    %63 = vector.extract_strided_slice %1 {offsets = [0, 7], sizes = [8, 1], strides = [1, 1]} : vector<8x9xf32> to vector<8x1xf32>
    %64 = vector.broadcast %63 : vector<8x1xf32> to vector<8x256xf32>
    %65 = arith.mulf %62, %64 : vector<8x256xf32>
    %66 = arith.addf %58, %65 : vector<8x256xf32>
    %c239_i32 = arith.constant 239 : i32
    %67 = tpu.dynamic_rotate %0 by %c239_i32 dim 1 : vector<8x256xf32>, i32 -> vector<8x256xf32>
    %68 = vector.extract_strided_slice %2 {offsets = [8, 0], sizes = [1, 256], strides = [1, 1]} : vector<9x256xf32> to vector<1x256xf32>
    %69 = vector.broadcast %68 : vector<1x256xf32> to vector<8x256xf32>
    %70 = arith.mulf %67, %69 : vector<8x256xf32>
    %71 = vector.extract_strided_slice %1 {offsets = [0, 8], sizes = [8, 1], strides = [1, 1]} : vector<8x9xf32> to vector<8x1xf32>
    %72 = vector.broadcast %71 : vector<8x1xf32> to vector<8x256xf32>
    %73 = arith.mulf %70, %72 : vector<8x256xf32>
    %74 = arith.addf %66, %73 : vector<8x256xf32>
    %cst_5 = arith.constant dense<0.000000e+00> : vector<8xf32>
    %75 = vector.multi_reduction <add>, %74, %cst_5 [1] : vector<8x256xf32> to vector<8xf32>
    %76 = vector.shape_cast %75 : vector<8xf32> to vector<8x1xf32>
    %c0_6 = arith.constant 0 : index
    %c0_7 = arith.constant 0 : index
    %77 = vector.load %arg4[%c0_6, %c0_7] : memref<8x1xf32, #tpu.memory_space<vmem>>, vector<8x1xf32>
    tpu.vector_store %arg4[%c0_6, %c0_7], %76 {strides = array<i32>} : memref<8x1xf32, #tpu.memory_space<vmem>>, vector<8x1xf32>,
    %78 = arith.mulf %74, %74 : vector<8x256xf32>
    %cst_8 = arith.constant dense<0.000000e+00> : vector<8xf32>
    %79 = vector.multi_reduction <add>, %78, %cst_8 [1] : vector<8x256xf32> to vector<8xf32>
    %80 = vector.shape_cast %79 : vector<8xf32> to vector<8x1xf32>
    %c0_9 = arith.constant 0 : index
    %c0_10 = arith.constant 0 : index
    %81 = vector.load %arg5[%c0_9, %c0_10] : memref<8x1xf32, #tpu.memory_space<vmem>>, vector<8x1xf32>
    tpu.vector_store %arg5[%c0_9, %c0_10], %80 {strides = array<i32>} : memref<8x1xf32, #tpu.memory_space<vmem>>, vector<8x1xf32>,
    return
  }
  func.func @transform_0(%arg0: i32) -> (i32, i32) {
    %c0_i32 = arith.constant 0 : i32
    %c0_i32_0 = arith.constant 0 : i32
    return %arg0, %c0_i32 : i32, i32
  }
  func.func @transform_1(%arg0: i32) -> (i32, i32) {
    %c0_i32 = arith.constant 0 : i32
    %c0_i32_0 = arith.constant 0 : i32
    return %arg0, %c0_i32 : i32, i32
  }
  func.func @transform_2(%arg0: i32) -> (i32, i32) {
    %c0_i32 = arith.constant 0 : i32
    %c0_i32_0 = arith.constant 0 : i32
    %c0_i32_1 = arith.constant 0 : i32
    return %c0_i32, %c0_i32_0 : i32, i32
  }
  func.func @transform_3(%arg0: i32) -> (i32, i32) {
    %c0_i32 = arith.constant 0 : i32
    %c0_i32_0 = arith.constant 0 : i32
    return %arg0, %c0_i32 : i32, i32
  }
  func.func @transform_4(%arg0: i32) -> (i32, i32) {
    %c0_i32 = arith.constant 0 : i32
    %c0_i32_0 = arith.constant 0 : i32
    return %arg0, %c0_i32 : i32, i32
  }
}

</mosaic_0001>

<bundles_post_ra>
// kernel: tpu_custom_call.1
= control target key start
LH: loop header
LB: loop body
LE: loop exit
PB: predicated region body
PF: predicated region fallthrough
CT: control target
= control target key end

     0   :  { %10 = vsyncpa [#allocation3], 0  ;;  %s561_s0 = inlined_call_operand.hbm [shape: f32[8,256], index: 0, kind: input, shape index: {}]   ;;  %s562_s1 = inlined_call_operand.hbm [shape: f32[8,9], index: 1, kind: input, shape index: {}]   ;;  %s563_s2 = inlined_call_operand.hbm [shape: f32[9,256], index: 2, kind: input, shape index: {}]   ;;  %s564_s3 = inlined_call_operand.vmem [shape: f32[8,1], index: 3, kind: output, shape index: {0}]   ;;  %s565_s4 = inlined_call_operand.vmem [shape: f32[8,1], index: 4, kind: output, shape index: {1}]  }
   0x1   :  { %11 = vsyncpa [#allocation5], 0  ;;  %s398_s15 = smov [#allocation4]   ;;  %s399_s17 = smov [#allocation2]  }
   0x2   :  { %s28_s16 = sshll.u32 %s398_s15, 4  ;;  %s18_s18 = sshll.u32 %s399_s17, 4  ;;  %s29_s16 = int_to_ptr.vmem [resolvable:$true] %s28_s16  ;;  %s19_s18 = int_to_ptr.vmem [resolvable:$true] %s18_s18 }
   0x3   :  { %s342_s19 = scalar_lea.vmem %s29_s16, 128  ;;  %p347_p1 = scmp.lt.s32.totalorder %s29_s16, %s29_s16 }
   0x4   :  { %p343_p0 = scmp.ne.s32.totalorder %s29_s16, %s342_s19  ;;  %p348_p2 = scmp.lt.s32.totalorder %s342_s19, %s342_s19 }
   0x6   :  { %p349_p3 = por %p348_p2, %p347_p1 }
   0x8   :  { %p350_p4 = pnand %p349_p3, %p343_p0 }
   0xa   :  { %353 = shalt.err (!%p350_p4)
}
   0xb   :  { %31 = dma.hbm_to_vmem [thread:$0]  %s562_s1, 128, %s29_s16, [#allocation5]  }
   0xc   :  { %s362_s22 = scalar_lea.vmem %s19_s18, 256  ;;  %p367_p6 = scmp.lt.s32.totalorder %s19_s18, %s19_s18 }
   0xd   :  { %p363_p5 = scmp.ne.s32.totalorder %s19_s18, %s362_s22  ;;  %p368_p7 = scmp.lt.s32.totalorder %s362_s22, %s362_s22 }
   0xf   :  { %p369_p8 = por %p368_p7, %p367_p6 }
  0x11   :  { %p370_p9 = pnand %p369_p8, %p363_p5 }
  0x13   :  { %373 = shalt.err (!%p370_p9)
}
  0x14   :  { %21 = dma.hbm_to_vmem [thread:$0]  %s561_s0, 256, %s19_s18, [#allocation3]  }
  0x15   :  { %s400_s25 = smov [#allocation6]  }
  0x16   :  { %s37_s26 = sshll.u32 %s400_s25, 4  ;;  %s38_s26 = int_to_ptr.vmem [resolvable:$true] %s37_s26 }
  0x17   :  { %s382_s27 = scalar_lea.vmem %s38_s26, 512  ;;  %p387_p11 = scmp.lt.s32.totalorder %s38_s26, %s38_s26 }
  0x18   :  { %p383_p10 = scmp.ne.s32.totalorder %s38_s26, %s382_s27  ;;  %p388_p12 = scmp.lt.s32.totalorder %s382_s27, %s382_s27 }
  0x1a   :  { %p389_p13 = por %p388_p12, %p387_p11 }
  0x1c   :  { %p390_p0 = pnand %p389_p13, %p383_p10 }
  0x1e   :  { %393 = shalt.err (!%p390_p0)
}
  0x1f   :  { %s401_s1 = smov 256   ;;  %s402_s28 = smov 16  }
  0x20   :  { %43 = dma.hbm_to_vmem [thread:$0]  %s563_s2, 512, %s38_s26, [#allocation5], %s401_s1, %s401_s1, %s402_s28  }
  0x21   :  { %394 = dma.done.wait [#allocation3], 256  }
  0x22   :  { %395 = vsyncadd [#allocation3], 4294967040 }
  0x23   :  { %396 = dma.done.wait [#allocation5], 640  }
  0x24   :  { %397 = vsyncadd [#allocation5], 4294966656  ;;  %v403_v0 = vmov 0   ;;  %v404_v1 = vmov 2   ;;  %v55_v2 = vld [vmem:[#allocation4] sm:$0xff]  ;;  %v453_v3 = vld [vmem:[#allocation2] sm:$0xff]  ;;  %v64_v21 = vlaneseq }
  0x25   :  { %325 = vset.pattern.permute.xlu0 %v403_v0  ;;  %327 = vset.pattern.permute.xlu1 %v404_v1  ;;  %s405_s0 = smov 17   ;;  %v456_v4 = vld [vmem:[#allocation2 + $0x8] sm:$0xff]  ;;  %v406_v5 = vmov 1   ;;  %v407_v6 = vmov 3   ;;  %s408_s2 = smov 15   ;;  %v409_v7 = vmov 5  }
  0x26   :  { %81 = vperm.xlu0 %325, %v55_v2   ;;  %60 = vrot.lane.b32.xlu1 %v453_v3, %s405_s0  ;;  %s410_s5 = smov 1   ;;  %v411_v8 = vmov 4   ;;  %s412_s6 = smov 127   ;;  %v413_v9 = vmov 7   ;;  %v415_v10 = vmov 6   ;;  %v416_v11 = vmov 8  }
  0x27   :  { %s414_s7 = smov 113   ;;  %s417_s8 = smov 112   ;;  %v477_v24 = vshrl.u32 %v64_v21, 7  ;;  %v483_v27 = vand.u32 127, %v64_v21  ;;  %v486_v29 = vld [vmem:[#allocation6] sm:$0xff]  ;;  %v489_v31 = vld [vmem:[#allocation6 + $0x8] sm:$0xff] }
  0x28   :  { %s418_s9 = smov 111   ;;  %vm284_vm8 = vcmask 7168  }
  0x29   :  { %v71_v28 = vsub.s32 0, %v477_v24  ;;  %v97_v30 = vsub.s32 1, %v477_v24  ;;  %v122_v32 = vsub.s32 2, %v477_v24  ;;  %vm92_vm0 = vcmp.lt.s32.totalorder %v483_v27, 16 }
  0x2a   :  { %326 = vset.pattern.permute.xlu0 %v406_v5  ;;  %62 = vrot.lane.b32.xlu1 %v456_v4, %s405_s0  ;;  %v147_v33 = vsub.s32 3, %v477_v24  ;;  %v165_v34 = vsub.s32 4, %v477_v24  ;;  %vm66_vm1 = vcmp.lt.s32.totalorder %v483_v27, 17  ;;  %vm117_vm2 = vcmp.lt.s32.totalorder %v483_v27, 15 }
  0x2b   :  { %106 = vperm.xlu0 %326, %v55_v2   ;;  %v72_v36 = vrot.slane %v486_v29, %v71_v28  ;;  %v76_v37 = vrot.slane %v489_v31, %v71_v28  ;;  %v98_v38 = vrot.slane %v486_v29, %v97_v30  ;;  %v102_v39 = vrot.slane %v489_v31, %v97_v30 }
  0x2c   :  { %v123_v43 = vrot.slane %v486_v29, %v122_v32  ;;  %v127_v44 = vrot.slane %v489_v31, %v122_v32  ;;  %vm142_vm3 = vcmp.lt.s32.totalorder %v483_v27, 1  ;;  %v148_v45 = vrot.slane %v486_v29, %v147_v33 }
  0x2d   :  { %v166_v46 = vrot.slane %v486_v29, %v165_v34  ;;  %v170_v47 = vrot.slane %v489_v31, %v165_v34  ;;  %v152_v51 = vrot.slane %v489_v31, %v147_v33  ;;  %v190_v52 = vsub.s32 5, %v477_v24 }
  0x2e   :  { %88 = vrot.lane.b32.xlu1 %v453_v3, %s402_s28  ;;  %v215_v59 = vsub.s32 6, %v477_v24  ;;  %vm185_vm4 = vcmp.lt.s32.totalorder %v483_v27, 127  ;;  %vm210_vm5 = vcmp.lt.s32.totalorder %v483_v27, 113  ;;  %vm235_vm6 = vcmp.lt.s32.totalorder %v483_v27, 112 }
  0x2f   :  { %90 = vrot.lane.b32.xlu0 %v456_v4, %s402_s28  ;;  %v172_v62 = vmul.f32 %v170_v47, %v456_v4  ;;  %v171_v63 = vmul.f32 %v166_v46, %v453_v3  ;;  %vm260_vm7 = vcmp.lt.s32.totalorder %v483_v27, 111 }
  0x30   :  { %328 = vset.pattern.permute.xlu0 %v407_v6  ;;  %v191_v6 = vrot.slane %v486_v29, %v190_v52 }
  0x32   :  { %131 = vperm.xlu1 %327, %v55_v2  }
  0x33   :  { %113 = vrot.lane.b32.xlu0 %v453_v3, %s408_s2 }
  0x36   :  { %115 = vrot.lane.b32.xlu1 %v456_v4, %s408_s2 }
  0x37   :  { %156 = vperm.xlu0 %328, %v55_v2   ;;  %330 = vset.pattern.permute.xlu1 %v409_v7 }
  0x3a   :  { %138 = vrot.lane.b32.xlu1 %v453_v3, %s410_s5 }
  0x3b   :  { %329 = vset.pattern.permute.xlu0 %v411_v8 }
  0x3c   :  { %174 = vperm.xlu0 %329, %v55_v2  }
  0x3e   :  { %140 = vrot.lane.b32.xlu1 %v456_v4, %s410_s5 }
  0x40   :  { %183 = vrot.lane.b32.xlu0 %v456_v4, %s412_s6 }
  0x41   :  { %332 = vset.pattern.permute.xlu0 %v413_v9 }
  0x42   :  { %199 = vperm.xlu1 %330, %v55_v2  }
  0x44   :  { %206 = vrot.lane.b32.xlu0 %v453_v3, %s414_s7 }
  0x46   :  { %181 = vrot.lane.b32.xlu1 %v453_v3, %s412_s6 }
  0x47   :  { %331 = vset.pattern.permute.xlu1 %v415_v10 }
  0x48   :  { %249 = vperm.xlu0 %332, %v55_v2  }
  0x4a   :  { %224 = vperm.xlu1 %331, %v55_v2  }
  0x4c   :  { %333 = vset.pattern.permute.xlu0 %v416_v11  ;;  %v195_v11 = vrot.slane %v489_v31, %v190_v52 }
  0x4d   :  { %274 = vperm.xlu0 %333, %v55_v2  }
  0x4e   :  { %208 = vrot.lane.b32.xlu1 %v456_v4, %s414_s7 }
  0x52   :  { %231 = vrot.lane.b32.xlu1 %v453_v3, %s417_s8 }
  0x56   :  { %233 = vrot.lane.b32.xlu1 %v456_v4, %s417_s8 }
  0x5a   :  { %256 = vrot.lane.b32.xlu1 %v453_v3, %s418_s9  ;;  %v240_v3 = vsub.s32 7, %v477_v24 }
  0x5c   :  { %v241_v32 = vrot.slane %v486_v29, %v240_v3  ;;  %v245_v33 = vrot.slane %v489_v31, %v240_v3 }
  0x5e   :  { %258 = vrot.lane.b32.xlu1 %v456_v4, %s418_s9  ;;  %v216_v4 = vrot.slane %v486_v29, %v215_v59 }
  0x98   :  { %v61_v12 = vpop.permute.xlu1 %60 }
  0x9c   :  { %v63_v13 = vpop.permute.xlu1 %62 }
  0x9d   :  { %v67_v53 = vsel %vm66_vm1, %v61_v12, %v63_v13  ;;  %v68_v54 = vsel %vm66_vm1, %v63_v13, %v61_v12 }
  0x9e   :  { %v77_v2 = vmul.f32 %v72_v36, %v68_v54  ;;  %v78_v5 = vmul.f32 %v76_v37, %v67_v53 }
  0xa0   :  { %v89_v14 = vpop.permute.xlu1 %88 }
  0xa1   :  { %v473_v15 = vpop.permute.xlu0 %81 }
  0xa2   :  { %v84_v12 = vmul.f32 %v473_v15, %v77_v2  ;;  %v85_v13 = vmul.f32 %v473_v15, %v78_v5 }
  0xa6   :  { %v107_v17 = vpop.permute.xlu0 %106 }
  0xaa   :  { %v91_v19 = vpop.permute.xlu0 %90 }
  0xab   :  { %v93_v41 = vsel %vm92_vm0, %v89_v14, %v91_v19  ;;  %v94_v42 = vsel %vm92_vm0, %v91_v19, %v89_v14 }
  0xac   :  { %v103_v55 = vmul.f32 %v98_v38, %v94_v42  ;;  %v104_v56 = vmul.f32 %v102_v39, %v93_v41 }
  0xad   :  { %v475_v16 = vpop.permute.xlu1 %131 }
  0xae   :  { %v114_v22 = vpop.permute.xlu0 %113  ;;  %v109_v7 = vmul.f32 %v107_v17, %v103_v55  ;;  %v110_v8 = vmul.f32 %v107_v17, %v104_v56  ;;  %v302_v55 = vld [vmem:[#allocation6 + $0x10] ss:$0 sm:$0xff]  ;;  %v303_v56 = vld [vmem:[#allocation6 + $0x18] ss:$0 sm:$0xff] }
  0xb0   :  { %v112_v24 = vadd.f32 %v110_v8, %v85_v13 }
  0xb1   :  { %v116_v18 = vpop.permute.xlu1 %115 }
  0xb2   :  { %v479_v25 = vpop.permute.xlu0 %156  ;;  %v118_v49 = vsel %vm117_vm2, %v114_v22, %v116_v18  ;;  %v119_v50 = vsel %vm117_vm2, %v116_v18, %v114_v22  ;;  %v220_v22 = vrot.slane %v489_v31, %v215_v59 }
  0xb3   :  { %v128_v60 = vmul.f32 %v123_v43, %v119_v50  ;;  %v129_v61 = vmul.f32 %v127_v44, %v118_v49 }
  0xb5   :  { %v139_v20 = vpop.permute.xlu1 %138  ;;  %v134_v14 = vmul.f32 %v475_v16, %v128_v60  ;;  %v135_v18 = vmul.f32 %v475_v16, %v129_v61 }
  0xb7   :  { %v501_v40 = vpop.permute.xlu0 %174 }
  0xb8   :  { %v177_v39 = vmul.f32 %v501_v40, %v171_v63  ;;  %v178_v41 = vmul.f32 %v501_v40, %v172_v62 }
  0xb9   :  { %v141_v23 = vpop.permute.xlu1 %140 }
  0xba   :  { %v143_v57 = vsel %vm142_vm3, %v139_v20, %v141_v23  ;;  %v144_v58 = vsel %vm142_vm3, %v141_v23, %v139_v20  ;;  %v111_v23 = vadd.f32 %v109_v7, %v84_v12 }
  0xbb   :  { %v184_v0 = vpop.permute.xlu0 %183  ;;  %v153_v9 = vmul.f32 %v148_v45, %v144_v58  ;;  %v154_v10 = vmul.f32 %v152_v51, %v143_v57 }
  0xbc   :  { %v136_v34 = vadd.f32 %v134_v14, %v111_v23 }
  0xbd   :  { %v481_v26 = vpop.permute.xlu1 %199  ;;  %v159_v15 = vmul.f32 %v479_v25, %v153_v9  ;;  %v160_v28 = vmul.f32 %v479_v25, %v154_v10 }
  0xbf   :  { %v207_v19 = vpop.permute.xlu0 %206  ;;  %v161_v43 = vadd.f32 %v159_v15, %v136_v34 }
  0xc1   :  { %v182_v35 = vpop.permute.xlu1 %181  ;;  %v179_v40 = vadd.f32 %v177_v39, %v161_v43 }
  0xc2   :  { %v186_v20 = vsel %vm185_vm4, %v182_v35, %v184_v0  ;;  %v187_v21 = vsel %vm185_vm4, %v184_v0, %v182_v35  ;;  %v137_v35 = vadd.f32 %v135_v18, %v112_v24 }
  0xc3   :  { %v196_v36 = vmul.f32 %v191_v6, %v186_v20  ;;  %v197_v37 = vmul.f32 %v195_v11, %v187_v21  ;;  %v250_v51 = vpop.permute.xlu0 %249 }
  0xc4   :  { %v162_v44 = vadd.f32 %v160_v28, %v137_v35 }
  0xc5   :  { %v509_v48 = vpop.permute.xlu1 %224  ;;  %v202_v31 = vmul.f32 %v481_v26, %v196_v36  ;;  %v203_v46 = vmul.f32 %v481_v26, %v197_v37 }
  0xc6   :  { %v180_v52 = vadd.f32 %v178_v41, %v162_v44 }
  0xc7   :  { %v204_v57 = vadd.f32 %v202_v31, %v179_v40 }
  0xc8   :  { %v205_v58 = vadd.f32 %v203_v46, %v180_v52  ;;  %v275_v63 = vpop.permute.xlu0 %274 }
  0xc9   :  { %v209_v1 = vpop.permute.xlu1 %208 }
  0xca   :  { %v211_v16 = vsel %vm210_vm5, %v207_v19, %v209_v1  ;;  %v212_v30 = vsel %vm210_vm5, %v209_v1, %v207_v19 }
  0xcb   :  { %v221_v29 = vmul.f32 %v216_v4, %v211_v16  ;;  %v222_v45 = vmul.f32 %v220_v22, %v212_v30 }
  0xcd   :  { %v232_v17 = vpop.permute.xlu1 %231  ;;  %v227_v53 = vmul.f32 %v509_v48, %v221_v29  ;;  %v228_v54 = vmul.f32 %v509_v48, %v222_v45 }
  0xcf   :  { %v229_v0 = vadd.f32 %v227_v53, %v204_v57  ;;  %v230_v1 = vadd.f32 %v228_v54, %v205_v58 }
  0xd1   :  { %v234_v38 = vpop.permute.xlu1 %233 }
  0xd2   :  { %v236_v25 = vsel %vm235_vm6, %v232_v17, %v234_v38  ;;  %v237_v42 = vsel %vm235_vm6, %v234_v38, %v232_v17 }
  0xd3   :  { %v246_v47 = vmul.f32 %v241_v32, %v236_v25  ;;  %v247_v49 = vmul.f32 %v245_v33, %v237_v42 }
  0xd5   :  { %v257_v50 = vpop.permute.xlu1 %256  ;;  %v252_v59 = vmul.f32 %v250_v51, %v246_v47  ;;  %v253_v60 = vmul.f32 %v250_v51, %v247_v49 }
  0xd7   :  { %v254_v5 = vadd.f32 %v252_v59, %v229_v0  ;;  %v255_v6 = vadd.f32 %v253_v60, %v230_v1 }
  0xd9   :  { %v259_v61 = vpop.permute.xlu1 %258 }
  0xda   :  { %v261_v26 = vsel %vm260_vm7, %v257_v50, %v259_v61  ;;  %v262_v62 = vsel %vm260_vm7, %v259_v61, %v257_v50 }
  0xdb   :  { %v271_v2 = vmul.f32 %v302_v55, %v261_v26  ;;  %v272_v27 = vmul.f32 %v303_v56, %v262_v62 }
  0xdd   :  { %v277_v7 = vmul.f32 %v275_v63, %v271_v2  ;;  %v278_v8 = vmul.f32 %v275_v63, %v272_v27 }
  0xdf   :  { %v279_v9 = vadd.f32 %v277_v7, %v254_v5  ;;  %v280_v48 = vadd.f32 %v278_v8, %v255_v6 }
  0xe1   :  { %v281_v10 = vadd.f32 %v280_v48, %v279_v9  ;;  %v286_v11 = vmul.f32 %v279_v9, %v279_v9  ;;  %v287_v4 = vmul.f32 %v280_v48, %v280_v48 }
  0xe3   :  { %282 = vadd.xlane.f32.xlu0 %v281_v10  ;;  %v288_v3 = vadd.f32 %v287_v4, %v286_v11 }
  0xe5   :  { %289 = vadd.xlane.f32.xlu1 %v288_v3 }
 0x16c   :  { %v283_v12 = vpop.xlane.xlu0 %282 }
 0x16d   :  { %285 = vst.msk [vmem:[%s564_s3] sm:$0xff] %vm284_vm8, %v283_v12 }
 0x16e   :  { %v290_v13 = vpop.xlane.xlu1 %289 }
 0x16f   :  { %291 = vst.msk [vmem:[%s565_s4] sm:$0xff] %vm284_vm8, %v290_v13 }
 0x170   :  { %300 = vsyncpa [#allocation3], 1 }
 0x171   :  { %301 = vsyncpa [#allocation5], 1 }

</bundles_post_ra>
